<compile_context>
chip_gen: v6e
topology: v6e:2x2x1
jax: 0.10.0
libtpu: 0.0.40
codegen_flags: <defaults>
</compile_context>

<pallas_src>
import functools

import jax
import jax.numpy as jnp
import numpy as np
from jax.experimental import pallas as pl
from jax.experimental.pallas import tpu as pltpu


def _round_up(x, m):
    return (x + m - 1) // m * m


def _vmem_capacity_bytes():
    """Physical VMEM per TensorCore; conservative fallback if unavailable."""
    try:
        info = pltpu.get_tpu_info()
        for name in ("vmem_capacity_bytes", "vmem_size_bytes", "vmem_bytes"):
            cap = getattr(info, name, None)
            if cap:
                return int(cap)
    except Exception:
        pass
    return 64 * 1024 * 1024  # v7x per-TC budget; safe on every generation


# ----------------------------------------------------------------------------
# Fused projection: H = tanh(feats @ W_flat), W_flat branch-major (Fin, order*F)
# ----------------------------------------------------------------------------
def _proj_kernel(feat_ref, w_ref, out_ref, acc_ref, *, active):
    k = pl.program_id(1)

    @pl.when(k == 0)
    def _():
        acc_ref[...] = jnp.zeros_like(acc_ref)

    acc_ref[...] += jnp.dot(feat_ref[...], w_ref[...],
                            preferred_element_type=jnp.float32)

    @pl.when(k == pl.num_programs(1) - 1)
    def _():
        h = acc_ref[...]
        if active:
            h = jnp.tanh(h)
        out_ref[...] = h.astype(out_ref.dtype)


def _project(features, w_flat, *, row_block, fin_block, out_dtype, active,
             vmem_limit):
    n, fin = features.shape
    ow = w_flat.shape[1]
    return pl.pallas_call(
        functools.partial(_proj_kernel, active=active),
        out_shape=jax.ShapeDtypeStruct((n, ow), out_dtype),
        grid_spec=pltpu.PrefetchScalarGridSpec(
            num_scalar_prefetch=0,
            grid=(n // row_block, fin // fin_block),
            in_specs=[pl.BlockSpec((row_block, fin_block), lambda i, k: (i, k)),
                      pl.BlockSpec((fin_block, ow), lambda i, k: (k, 0))],
            out_specs=pl.BlockSpec((row_block, ow), lambda i, k: (i, 0)),
            scratch_shapes=[pltpu.VMEM((row_block, ow), jnp.float32)]),
        compiler_params=pltpu.CompilerParams(
            dimension_semantics=("parallel", "arbitrary"),
            vmem_limit_bytes=vmem_limit),
    )(features, w_flat)


# ----------------------------------------------------------------------------
# Streamed adjacency matmul: G = adj @ x
#   adj streamed in (row_block, k_block) tiles; x VMEM-resident for the whole
#   call; output accumulated directly in out_ref; per-row-block column sums
#   emitted in the k == last epilogue (for the attention means).
# ----------------------------------------------------------------------------
def _spmm_kernel(adj_ref, x_ref, out_ref, colsum_ref):
    k = pl.program_id(1)
    kb = adj_ref.shape[1]

    @pl.when(k == 0)
    def _():
        out_ref[...] = jnp.zeros_like(out_ref)

    start = pl.multiple_of(k * kb, kb)
    x_blk = x_ref[pl.ds(start, kb), :]
    out_ref[...] += jnp.dot(adj_ref[...], x_blk,
                            preferred_element_type=jnp.float32)

    @pl.when(k == pl.num_programs(1) - 1)
    def _():
        sums = jnp.sum(out_ref[...], axis=0)                      # (ow,)
        colsum_ref[...] = jnp.broadcast_to(sums[None, :], colsum_ref.shape)


def _spmm(adj, x, *, row_block, k_block, vmem_limit):
    n = adj.shape[0]
    ow = x.shape[1]
    nrb = n // row_block
    return pl.pallas_call(
        _spmm_kernel,
        out_shape=(jax.ShapeDtypeStruct((n, ow), jnp.float32),
                   jax.ShapeDtypeStruct((nrb * 8, ow), jnp.float32)),
        grid_spec=pltpu.PrefetchScalarGridSpec(
            num_scalar_prefetch=0,
            grid=(nrb, n // k_block),
            in_specs=[pl.BlockSpec((row_block, k_block), lambda i, k: (i, k)),
                      pl.BlockSpec((n, ow), lambda i, k: (0, 0))],
            out_specs=[pl.BlockSpec((row_block, ow), lambda i, k: (i, 0)),
                       pl.BlockSpec((8, ow), lambda i, k: (i, 0))]),
        compiler_params=pltpu.CompilerParams(
            dimension_semantics=("parallel", "arbitrary"),
            vmem_limit_bytes=vmem_limit),
    )(adj, x)


# ----------------------------------------------------------------------------
# Tiny attention head: means (order, F) -> softmax(fc2(relu(fc1(.))), dim=0)
# flattened branch-major to (1, order*F).
# ----------------------------------------------------------------------------
def _attn_kernel(mean_ref, w1_ref, b1_ref, w2_ref, b2_ref, out_ref, *, order):
    h1 = jnp.dot(mean_ref[...], w1_ref[...],
                 preferred_element_type=jnp.float32) + b1_ref[...]
    h1 = jnp.maximum(h1, 0.0)
    h2 = jnp.dot(h1, w2_ref[...],
                 preferred_element_type=jnp.float32) + b2_ref[...]
    attn = jax.nn.softmax(h2, axis=0)                              # (order, F)
    out_ref[...] = jnp.concatenate(
        [attn[j:j + 1, :] for j in range(order)], axis=1)          # (1, order*F)


def _attention(means, fc1_w, fc1_b, fc2_w, fc2_b, *, order, fout):
    ow = order * fout
    return pl.pallas_call(
        functools.partial(_attn_kernel, order=order),
        out_shape=jax.ShapeDtypeStruct((1, ow), jnp.float32),
    )(means, fc1_w, fc1_b, fc2_w, fc2_b)


# ----------------------------------------------------------------------------
# Weighted sum of the diagonal branch windows of the chain products G_1..G_order
#   out = sum_t G_{t+1}[:, t*F:(t+1)*F] * attn_flat[:, t*F:(t+1)*F]
# ----------------------------------------------------------------------------
def _wsum_kernel(*refs, order, fout):
    attn = refs[0][...]                                            # (1, order*F)
    out_ref = refs[1 + order]
    acc = None
    for t in range(order):
        piece = (refs[1 + t][...] * attn)[:, t * fout:(t + 1) * fout]
        acc = piece if acc is None else acc + piece
    out_ref[...] = acc


def _weighted_sum(attn_flat, gs, *, row_block, fout, vmem_limit):
    order = len(gs)
    n, ow = gs[0].shape
    in_specs = [pl.BlockSpec((1, ow), lambda i: (0, 0))]
    in_specs += [pl.BlockSpec((row_block, ow), lambda i: (i, 0))
                 for _ in range(order)]
    return pl.pallas_call(
        functools.partial(_wsum_kernel, order=order, fout=fout),
        out_shape=jax.ShapeDtypeStruct((n, fout), jnp.float32),
        grid_spec=pltpu.PrefetchScalarGridSpec(
            num_scalar_prefetch=0,
            grid=(n // row_block,),
            in_specs=in_specs,
            out_specs=pl.BlockSpec((row_block, fout), lambda i: (i, 0))),
        compiler_params=pltpu.CompilerParams(
            dimension_semantics=("parallel",),
            vmem_limit_bytes=vmem_limit),
    )(attn_flat, *gs)


# ----------------------------------------------------------------------------
# Fully fused single-kernel path: adj read from HBM exactly once and held in
# VMEM; the whole layer (projection, chain, means, attention, weighted sum)
# runs in one pallas_call. Used whenever adj fits the VMEM budget.
# ----------------------------------------------------------------------------
def _fused_kernel(feat_ref, wflat_ref, adj_ref, w1_ref, b1_ref, w2_ref, b2_ref,
                  out_ref, *, order, fout, n_rows, active):
    g = jnp.dot(feat_ref[...], wflat_ref[...],
                preferred_element_type=jnp.float32)
    if active:
        g = jnp.tanh(g)
    adj = adj_ref[...]
    mm_dtype = adj_ref.dtype
    branches = []
    for t in range(order):
        g = jnp.dot(adj, g.astype(mm_dtype),
                    preferred_element_type=jnp.float32)
        branches.append(g[:, t * fout:(t + 1) * fout])             # branch t
    inv_n = 1.0 / float(n_rows)                                    # padded rows are 0
    means = jnp.concatenate(
        [jnp.sum(b, axis=0, keepdims=True) for b in branches], axis=0) * inv_n
    h1 = jnp.maximum(jnp.dot(means, w1_ref[...],
                             preferred_element_type=jnp.float32) + b1_ref[...],
                     0.0)
    attn = jax.nn.softmax(jnp.dot(h1, w2_ref[...],
                                  preferred_element_type=jnp.float32)
                          + b2_ref[...], axis=0)                   # (order, F)
    out = branches[0] * attn[0:1, :]
    for t in range(1, order):
        out = out + branches[t] * attn[t:t + 1, :]
    out_ref[...] = out


def _fused_layer(features, adj_mm, w_flat, fc1_w, fc1_b, fc2_w, fc2_b,
                 *, order, fout, n_rows, active, vmem_limit):
    n = features.shape[0]
    return pl.pallas_call(
        functools.partial(_fused_kernel, order=order, fout=fout,
                          n_rows=n_rows, active=active),
        out_shape=jax.ShapeDtypeStruct((n, fout), jnp.float32),
        compiler_params=pltpu.CompilerParams(vmem_limit_bytes=vmem_limit),
    )(features, w_flat, adj_mm, fc1_w, fc1_b, fc2_w, fc2_b)


# ----------------------------------------------------------------------------
# Tile planning for the streamed path
# ----------------------------------------------------------------------------
def _plan_streamed(n, *, mm_isz, ow, cap, row_block=None, k_block=None):
    if row_block is None:
        # target ~8 row blocks so megacore row sharding has balanced work
        row_block = min(512, max(128, _round_up((n + 7) // 8, 16)))
    row_block = max(8, _round_up(int(row_block), 8))
    row_block = min(row_block, _round_up(n, 8))
    np_pad = _round_up(n, row_block)

    # candidate k tiles: multiples of row_block that divide padded N and are
    # lane-dense (multiple of 128) or the full dimension.
    m = np_pad // row_block
    cands = [d * row_block for d in range(1, m + 1)
             if m % d == 0 and
             (d * row_block == np_pad or (d * row_block) % 128 == 0)]
    if k_block is not None:
        k_block = int(k_block)
        if k_block not in cands:
            raise ValueError(
                f"k_block={k_block} must divide padded N={np_pad}, be a multiple"
                f" of row_block={row_block}, and be a multiple of 128 (or the "
                f"full dim). Valid choices: {cands}")
    else:
        resident = 2 * np_pad * ow * mm_isz + 2 * row_block * ow * 4 + (2 << 20)
        budget = int(0.70 * cap) - resident
        per_k = 2 * row_block * mm_isz        # double-buffered adj bytes per k col
        fitting = [kb for kb in cands if kb * per_k <= budget]
        k_block = max(fitting) if fitting else min(cands)

    needed = (2 * row_block * k_block * mm_isz + 2 * np_pad * ow * mm_isz
              + 2 * row_block * ow * 4 + (4 << 20))
    vmem_limit = min(cap, needed + (16 << 20))
    return np_pad, row_block, k_block, vmem_limit


# ----------------------------------------------------------------------------
# Full NGNNLayer forward
# ----------------------------------------------------------------------------
def ngnn_layer(features, adj, weights, fc1_w, fc1_b, fc2_w, fc2_b,
               *, order=4, active=True, use_bf16_matmul=False,
               force_streamed=False, row_block=None, k_block=None):
    """features: (N, Fin); adj: (N, N) dense; weights: (order, Fin, Fout).
    fc1_w: (Fout, hid) [pre-transposed vs torch], fc1_b: (1, hid),
    fc2_w: (hid, Fout), fc2_b: (1, Fout)."""
    features = jnp.asarray(features, jnp.float32)
    adj = jnp.asarray(adj, jnp.float32)
    n, fin = features.shape
    fout = weights.shape[-1]
    ow = order * fout
    mm_dtype = jnp.bfloat16 if use_bf16_matmul else jnp.float32
    mm_isz = jnp.dtype(mm_dtype).itemsize
    cap = _vmem_capacity_bytes()

    # Branch-major fused projection weights: W_flat[:, t*F:(t+1)*F] = W_t
    w_flat = jnp.transpose(jnp.asarray(weights, jnp.float32),
                           (1, 0, 2)).reshape(fin, ow)
    fc1_w = jnp.asarray(fc1_w, jnp.float32)
    fc1_b = jnp.asarray(fc1_b, jnp.float32)
    fc2_w = jnp.asarray(fc2_w, jnp.float32)
    fc2_b = jnp.asarray(fc2_b, jnp.float32)

    # ---- adjacency-resident fused path (adj fits VMEM) ----------------------
    np_f = _round_up(n, 128) if n >= 128 else _round_up(n, 8)
    fused_need = (np_f * np_f * mm_isz + np_f * fin * 4 + 6 * np_f * ow * 4
                  + np_f * fout * 4 + (4 << 20))
    if (not force_streamed) and fused_need <= int(0.70 * cap):
        feats_p = (jnp.pad(features, ((0, np_f - n), (0, 0)))
                   if np_f != n else features)
        adj_p = (jnp.pad(adj, ((0, np_f - n), (0, np_f - n)))
                 if np_f != n else adj)
        adj_mm = adj_p.astype(mm_dtype)            # cast ONCE in HBM
        out = _fused_layer(feats_p, adj_mm, w_flat, fc1_w, fc1_b, fc2_w, fc2_b,
                           order=order, fout=fout, n_rows=n, active=active,
                           vmem_limit=min(cap, fused_need + cap // 4))
        return out[:n]

    # ---- streamed path: adj tiled from HBM, activations VMEM-resident -------
    np_s, rb, kb, spmm_limit = _plan_streamed(
        n, mm_isz=mm_isz, ow=ow, cap=cap, row_block=row_block, k_block=k_block)
    feats_p = (jnp.pad(features, ((0, np_s - n), (0, 0)))
               if np_s != n else features)
    adj_p = (jnp.pad(adj, ((0, np_s - n), (0, np_s - n)))
             if np_s != n else adj)
    adj_mm = adj_p.astype(mm_dtype)                # cast ONCE in HBM

    # 1) fused lane-dense projection (Fin tiled if large)
    if fin > 2048:
        fin_pad, fin_blk = _round_up(fin, 512), 512
        feats_p = jnp.pad(feats_p, ((0, 0), (0, fin_pad - fin)))
        w_flat_p = jnp.pad(w_flat, ((0, fin_pad - fin), (0, 0)))
    else:
        fin_blk, w_flat_p = fin, w_flat
    proj_limit = min(cap, 2 * rb * fin_blk * 4 + 2 * fin_blk * ow * 4
                     + 3 * rb * ow * 4 + (16 << 20))
    x = _project(feats_p, w_flat_p, row_block=rb, fin_block=fin_blk,
                 out_dtype=mm_dtype, active=active, vmem_limit=proj_limit)

    # 2) adjacency chain; branch t is the diagonal window of the (t+1)-th product
    gs, colsums = [], []
    for t in range(order):
        g, cs = _spmm(adj_mm, x, row_block=rb, k_block=kb,
                      vmem_limit=spmm_limit)
        gs.append(g)
        colsums.append(cs)
        if t + 1 < order:
            x = g.astype(mm_dtype) if use_bf16_matmul else g

    # 3) attention from the column sums folded into the matmul epilogues
    nrb = np_s // rb
    means = jnp.stack(
        [colsums[t].reshape(nrb, 8, ow)[:, 0, :].sum(axis=0)
         [t * fout:(t + 1) * fout] for t in range(order)],
        axis=0) * (1.0 / float(n))
    attn_flat = _attention(means, fc1_w, fc1_b, fc2_w, fc2_b,
                           order=order, fout=fout)

    # 4) attention-weighted sum of the branch windows
    wsum_limit = min(cap, 2 * (order + 1) * rb * ow * 4 + (16 << 20))
    out = _weighted_sum(attn_flat, gs, row_block=rb, fout=fout,
                        vmem_limit=wsum_limit)
    return out[:n]


# ----------------------------------------------------------------------------
# Pure-JAX reference
# ----------------------------------------------------------------------------
def _reference(features, adj, weights, fc1_w, fc1_b, fc2_w, fc2_b,
               order=4, active=True):
    abstract = []
    for i in range(order):
        h = features @ weights[i]
        if active:
            h = jnp.tanh(h)
        for _ in range(i + 1):
            h = adj @ h
        abstract.append(h)
    means = jnp.stack([a.mean(axis=0) for a in abstract], axis=0)
    h1 = jnp.maximum(means @ fc1_w + fc1_b, 0.0)
    attn = jax.nn.softmax(h1 @ fc2_w + fc2_b, axis=0)
    out = abstract[0] * attn[0][None, :]
    for i in range(1, order):
        out = out + abstract[i] * attn[i][None, :]
    return out


if __name__ == "__main__":
    Fin, Fout, reduction, order = 16, 32, 4, 4
    hid = Fout // reduction

    def make_inputs(key, N):
        ks = jax.random.split(key, 8)
        features = jax.random.normal(ks[0], (N, Fin), dtype=jnp.float32)
        a_raw = jax.random.uniform(ks[1], (N, N), dtype=jnp.float32)
        a_sym = (a_raw + a_raw.T) * 0.5
        adj = a_sym / jnp.sum(a_sym, axis=1, keepdims=True)   # row-normalized
        bound_w = float(np.sqrt(6.0 / (Fin + Fout)))
        weights = jax.random.uniform(ks[2], (order, Fin, Fout), dtype=jnp.float32,
                                     minval=-bound_w, maxval=bound_w)
        b1 = float(1.0 / np.sqrt(Fout))
        fc1_w = jax.random.uniform(ks[3], (Fout, hid), dtype=jnp.float32,
                                   minval=-b1, maxval=b1)
        fc1_b = jax.random.uniform(ks[4], (1, hid), dtype=jnp.float32,
                                   minval=-b1, maxval=b1)
        b2 = float(1.0 / np.sqrt(hid))
        fc2_w = jax.random.uniform(ks[5], (hid, Fout), dtype=jnp.float32,
                                   minval=-b2, maxval=b2)
        fc2_b = jax.random.uniform(ks[6], (1, Fout), dtype=jnp.float32,
                                   minval=-b2, maxval=b2)
        return features, adj, weights, fc1_w, fc1_b, fc2_w, fc2_b

    key = jax.random.PRNGKey(0)
    k1, k2, k3 = jax.random.split(key, 3)

    # --- Test 1: small graph -> adjacency-resident fused single-kernel path ---
    args = make_inputs(k1, 32)
    out = jax.block_until_ready(ngnn_layer(*args, order=order, active=True))
    ref = _reference(*args, order=order, active=True)
    np.testing.assert_allclose(np.asarray(out), np.asarray(ref),
                               rtol=1e-4, atol=1e-4)

    # --- Test 2: non-divisible N (padding path), fused kernel ---
    args2 = make_inputs(k2, 50)
    out2 = jax.block_until_ready(ngnn_layer(*args2, order=order, active=True))
    ref2 = _reference(*args2, order=order, active=True)
    np.testing.assert_allclose(np.asarray(out2), np.asarray(ref2),
                               rtol=1e-4, atol=1e-4)

    # --- Test 3: forced streamed path, multi row-block + multi k-block grid
    #             (exercises megacore-parallel rows, the k accumulator, the
    #              resident-x BlockSpec and the colsum epilogue) ---
    args3 = make_inputs(k3, 250)
    out3 = jax.block_until_ready(
        ngnn_layer(*args3, order=order, active=True,
                   force_streamed=True, row_block=64, k_block=128))
    ref3 = _reference(*args3, order=order, active=True)
    np.testing.assert_allclose(np.asarray(out3), np.asarray(ref3),
                               rtol=1e-4, atol=1e-4)

    # --- Test 4: streamed path with bf16 MXU operands cast once in HBM,
    #             f32 accumulation; loose tolerance by design ---
    out4 = jax.block_until_ready(
        ngnn_layer(*args3, order=order, active=True, use_bf16_matmul=True,
                   force_streamed=True, row_block=64, k_block=128))
    np.testing.assert_allclose(np.asarray(out4), np.asarray(ref3),
                               rtol=1e-1, atol=1e-1)

    print("KERNEL_OK")
</pallas_src>

<mosaic_0001>
module attributes {stable_mosaic.version = 11 : i64} {
  func.func @_fused_kernel(%arg0: memref<32x16xf32, #tpu.memory_space<vmem>>, %arg1: memref<16x128xf32, #tpu.memory_space<vmem>>, %arg2: memref<32x32xf32, #tpu.memory_space<vmem>>, %arg3: memref<32x8xf32, #tpu.memory_space<vmem>>, %arg4: memref<1x8xf32, #tpu.memory_space<vmem>>, %arg5: memref<8x32xf32, #tpu.memory_space<vmem>>, %arg6: memref<1x32xf32, #tpu.memory_space<vmem>>, %arg7: memref<32x32xf32, #tpu.memory_space<vmem>>) attributes {dimension_semantics = [], scalar_prefetch = 0 : i64, scratch_operands = 0 : i64, tpu.core_type = #tpu.core_type<tc>} {
    %c0 = arith.constant 0 : index
    %c0_0 = arith.constant 0 : index
    %0 = vector.load %arg0[%c0, %c0_0] : memref<32x16xf32, #tpu.memory_space<vmem>>, vector<32x16xf32>
    %c0_1 = arith.constant 0 : index
    %c0_2 = arith.constant 0 : index
    %1 = vector.load %arg1[%c0_1, %c0_2] : memref<16x128xf32, #tpu.memory_space<vmem>>, vector<16x128xf32>
    %cst = arith.constant dense<0.000000e+00> : vector<32x128xf32>
    %2 = tpu.matmul %0, %1, %cst {dimension_numbers = #tpu.dot_dimension_numbers<[1], [0], [0], [1], [0, 0, 1, 1], [], []>} : vector<32x16xf32>, vector<16x128xf32>, vector<32x128xf32> -> vector<32x128xf32>
    %3 = math.tanh %2 : vector<32x128xf32>
    %c0_3 = arith.constant 0 : index
    %c0_4 = arith.constant 0 : index
    %4 = vector.load %arg2[%c0_3, %c0_4] : memref<32x32xf32, #tpu.memory_space<vmem>>, vector<32x32xf32>
    %cst_5 = arith.constant dense<0.000000e+00> : vector<32x128xf32>
    %5 = tpu.matmul %4, %3, %cst_5 {dimension_numbers = #tpu.dot_dimension_numbers<[1], [0], [0], [1], [0, 0, 1, 1], [], []>} : vector<32x32xf32>, vector<32x128xf32>, vector<32x128xf32> -> vector<32x128xf32>
    %6 = vector.extract_strided_slice %5 {offsets = [0, 0], sizes = [32, 32], strides = [1, 1]} : vector<32x128xf32> to vector<32x32xf32>
    %cst_6 = arith.constant dense<0.000000e+00> : vector<32x128xf32>
    %7 = tpu.matmul %4, %5, %cst_6 {dimension_numbers = #tpu.dot_dimension_numbers<[1], [0], [0], [1], [0, 0, 1, 1], [], []>} : vector<32x32xf32>, vector<32x128xf32>, vector<32x128xf32> -> vector<32x128xf32>
    %8 = vector.extract_strided_slice %7 {offsets = [0, 32], sizes = [32, 32], strides = [1, 1]} : vector<32x128xf32> to vector<32x32xf32>
    %cst_7 = arith.constant dense<0.000000e+00> : vector<32x128xf32>
    %9 = tpu.matmul %4, %7, %cst_7 {dimension_numbers = #tpu.dot_dimension_numbers<[1], [0], [0], [1], [0, 0, 1, 1], [], []>} : vector<32x32xf32>, vector<32x128xf32>, vector<32x128xf32> -> vector<32x128xf32>
    %10 = vector.extract_strided_slice %9 {offsets = [0, 64], sizes = [32, 32], strides = [1, 1]} : vector<32x128xf32> to vector<32x32xf32>
    %cst_8 = arith.constant dense<0.000000e+00> : vector<32x128xf32>
    %11 = tpu.matmul %4, %9, %cst_8 {dimension_numbers = #tpu.dot_dimension_numbers<[1], [0], [0], [1], [0, 0, 1, 1], [], []>} : vector<32x32xf32>, vector<32x128xf32>, vector<32x128xf32> -> vector<32x128xf32>
    %12 = vector.extract_strided_slice %11 {offsets = [0, 96], sizes = [32, 32], strides = [1, 1]} : vector<32x128xf32> to vector<32x32xf32>
    %cst_9 = arith.constant dense<0.000000e+00> : vector<32xf32>
    %13 = vector.multi_reduction <add>, %6, %cst_9 [0] : vector<32x32xf32> to vector<32xf32>
    %14 = vector.shape_cast %13 : vector<32xf32> to vector<1x32xf32>
    %cst_10 = arith.constant dense<0.000000e+00> : vector<32xf32>
    %15 = vector.multi_reduction <add>, %8, %cst_10 [0] : vector<32x32xf32> to vector<32xf32>
    %16 = vector.shape_cast %15 : vector<32xf32> to vector<1x32xf32>
    %cst_11 = arith.constant dense<0.000000e+00> : vector<32xf32>
    %17 = vector.multi_reduction <add>, %10, %cst_11 [0] : vector<32x32xf32> to vector<32xf32>
    %18 = vector.shape_cast %17 : vector<32xf32> to vector<1x32xf32>
    %cst_12 = arith.constant dense<0.000000e+00> : vector<32xf32>
    %19 = vector.multi_reduction <add>, %12, %cst_12 [0] : vector<32x32xf32> to vector<32xf32>
    %20 = vector.shape_cast %19 : vector<32xf32> to vector<1x32xf32>
    %21 = tpu.concatenate %14, %16, %18, %20 in 0 : vector<1x32xf32>, vector<1x32xf32>, vector<1x32xf32>, vector<1x32xf32> -> vector<4x32xf32>
    %cst_13 = arith.constant 3.125000e-02 : f32
    %22 = vector.broadcast %cst_13 : f32 to vector<4x32xf32>
    %23 = arith.mulf %21, %22 : vector<4x32xf32>
    %c0_14 = arith.constant 0 : index
    %c0_15 = arith.constant 0 : index
    %24 = vector.load %arg3[%c0_14, %c0_15] : memref<32x8xf32, #tpu.memory_space<vmem>>, vector<32x8xf32>
    %cst_16 = arith.constant dense<0.000000e+00> : vector<4x8xf32>
    %25 = tpu.matmul %23, %24, %cst_16 {dimension_numbers = #tpu.dot_dimension_numbers<[1], [0], [0], [1], [0, 0, 1, 1], [], []>} : vector<4x32xf32>, vector<32x8xf32>, vector<4x8xf32> -> vector<4x8xf32>
    %c0_17 = arith.constant 0 : index
    %c0_18 = arith.constant 0 : index
    %26 = vector.load %arg4[%c0_17, %c0_18] : memref<1x8xf32, #tpu.memory_space<vmem>>, vector<1x8xf32>
    %27 = vector.broadcast %26 : vector<1x8xf32> to vector<4x8xf32>
    %28 = arith.addf %25, %27 : vector<4x8xf32>
    %cst_19 = arith.constant 0.000000e+00 : f32
    %29 = vector.broadcast %cst_19 : f32 to vector<4x8xf32>
    %30 = arith.maximumf %28, %29 : vector<4x8xf32>
    %c0_20 = arith.constant 0 : index
    %c0_21 = arith.constant 0 : index
    %31 = vector.load %arg5[%c0_20, %c0_21] : memref<8x32xf32, #tpu.memory_space<vmem>>, vector<8x32xf32>
    %cst_22 = arith.constant dense<0.000000e+00> : vector<4x32xf32>
    %32 = tpu.matmul %30, %31, %cst_22 {dimension_numbers = #tpu.dot_dimension_numbers<[1], [0], [0], [1], [0, 0, 1, 1], [], []>} : vector<4x8xf32>, vector<8x32xf32>, vector<4x32xf32> -> vector<4x32xf32>
    %c0_23 = arith.constant 0 : index
    %c0_24 = arith.constant 0 : index
    %33 = vector.load %arg6[%c0_23, %c0_24] : memref<1x32xf32, #tpu.memory_space<vmem>>, vector<1x32xf32>
    %34 = vector.broadcast %33 : vector<1x32xf32> to vector<4x32xf32>
    %35 = arith.addf %32, %34 : vector<4x32xf32>
    %cst_25 = arith.constant dense<0xFF800000> : vector<32xf32>
    %36 = vector.multi_reduction <maximumf>, %35, %cst_25 [0] : vector<4x32xf32> to vector<32xf32>
    %cst_26 = arith.constant 0xFF800000 : f32
    %37 = vector.broadcast %cst_26 : f32 to vector<32xf32>
    %38 = arith.maximumf %37, %36 : vector<32xf32>
    %39 = vector.shape_cast %38 : vector<32xf32> to vector<1x32xf32>
    %40 = vector.broadcast %39 : vector<1x32xf32> to vector<4x32xf32>
    %41 = arith.subf %35, %40 : vector<4x32xf32>
    %42 = math.exp %41 : vector<4x32xf32>
    %cst_27 = arith.constant dense<0.000000e+00> : vector<32xf32>
    %43 = vector.multi_reduction <add>, %42, %cst_27 [0] : vector<4x32xf32> to vector<32xf32>
    %44 = vector.shape_cast %43 : vector<32xf32> to vector<1x32xf32>
    %45 = vector.broadcast %44 : vector<1x32xf32> to vector<4x32xf32>
    %46 = arith.divf %42, %45 : vector<4x32xf32>
    %47 = vector.extract_strided_slice %46 {offsets = [0, 0], sizes = [1, 32], strides = [1, 1]} : vector<4x32xf32> to vector<1x32xf32>
    %48 = vector.broadcast %47 : vector<1x32xf32> to vector<32x32xf32>
    %49 = arith.mulf %6, %48 : vector<32x32xf32>
    %50 = vector.extract_strided_slice %46 {offsets = [1, 0], sizes = [1, 32], strides = [1, 1]} : vector<4x32xf32> to vector<1x32xf32>
    %51 = vector.broadcast %50 : vector<1x32xf32> to vector<32x32xf32>
    %52 = arith.mulf %8, %51 : vector<32x32xf32>
    %53 = arith.addf %49, %52 : vector<32x32xf32>
    %54 = vector.extract_strided_slice %46 {offsets = [2, 0], sizes = [1, 32], strides = [1, 1]} : vector<4x32xf32> to vector<1x32xf32>
    %55 = vector.broadcast %54 : vector<1x32xf32> to vector<32x32xf32>
    %56 = arith.mulf %10, %55 : vector<32x32xf32>
    %57 = arith.addf %53, %56 : vector<32x32xf32>
    %58 = vector.extract_strided_slice %46 {offsets = [3, 0], sizes = [1, 32], strides = [1, 1]} : vector<4x32xf32> to vector<1x32xf32>
    %59 = vector.broadcast %58 : vector<1x32xf32> to vector<32x32xf32>
    %60 = arith.mulf %12, %59 : vector<32x32xf32>
    %61 = arith.addf %57, %60 : vector<32x32xf32>
    %c0_28 = arith.constant 0 : index
    %c0_29 = arith.constant 0 : index
    %62 = vector.load %arg7[%c0_28, %c0_29] : memref<32x32xf32, #tpu.memory_space<vmem>>, vector<32x32xf32>
    tpu.vector_store %arg7[%c0_28, %c0_29], %61 {strides = array<i32>} : memref<32x32xf32, #tpu.memory_space<vmem>>, vector<32x32xf32>,
    return
  }
}

</mosaic_0001>

<bundles_post_ra>
// kernel: tpu_custom_call.1
= control target key start
LH: loop header
LB: loop body
LE: loop exit
PB: predicated region body
PF: predicated region fallthrough
CT: control target
= control target key end

     0   :  { %vm33_vm0 = vcmask 130048   ;;  %s1321_s0 = inlined_call_operand.vmem [shape: f32[32,16], index: 0, kind: input, shape index: {}]   ;;  %s1322_s1 = inlined_call_operand.vmem [shape: f32[16,128], index: 1, kind: input, shape index: {}]   ;;  %s1323_s2 = inlined_call_operand.vmem [shape: f32[32,32], index: 2, kind: input, shape index: {}]   ;;  %s1324_s3 = inlined_call_operand.vmem [shape: f32[32,8], index: 3, kind: input, shape index: {}]   ;;  %s1325_s4 = inlined_call_operand.vmem [shape: f32[1,8], index: 4, kind: input, shape index: {}]   ;;  %s1326_s5 = inlined_call_operand.vmem [shape: f32[8,32], index: 5, kind: input, shape index: {}]   ;;  %s1327_s6 = inlined_call_operand.vmem [shape: f32[1,32], index: 6, kind: input, shape index: {}]   ;;  %s1328_s7 = inlined_call_operand.hbm [shape: f32[32,32], index: 7, kind: output, shape index: {}]  }
   0x1   :  { %v32_v0 = vld [vmem:[%s1322_s1 + $0x8] sm:$0xff]  ;;  %v31_v1 = vld [vmem:[%s1322_s1] sm:$0xff] }
   0x2   :  { %v27_v2 = vld [vmem:[%s1321_s0] sm:$0xff]  ;;  %946 = vmatprep.subr.mxu0 %v32_v0  ;;  %v28_v3 = vld [vmem:[%s1321_s0 + $0x8] sm:$0xff] }
   0x3   :  { %950 = vmatprep.mubr.msk.f32.mxu0 %vm33_vm0, %v27_v2  ;;  %947 = vmatpush3.msra.mxu0 %v32_v0 }
   0x4   :  { %12 = vsyncpa [#allocation3], 0  ;;  %948 = vmatprep.subr.mxu0 %v31_v1  ;;  %v29_v4 = vld [vmem:[%s1321_s0 + $0x10] sm:$0xff]  ;;  %v30_v5 = vld [vmem:[%s1321_s0 + $0x18] sm:$0xff]  ;;  %vm139_vm1 = vcmask 261120   ;;  %vm505_vm2 = vcmask 523520  }
   0x5   :  { %949 = vmatpush3.msra.mxu0 %v31_v1  ;;  %v135_v6 = vld [vmem:[%s1323_s2] sm:$0xff]  ;;  %v1144_v15 = vld [vmem:[%s1323_s2 + $0x8] sm:$0xff]  ;;  %v1149_v16 = vld [vmem:[%s1323_s2 + $0x10] sm:$0xff]  ;;  %vm519_vm3 = vcmask 785920   ;;  %s1071_s19 = smov 64   ;;  %v1072_v57 = vmov 0.0  }
   0x6   :  { %951 = vmatmul.mubr.msk.f32.vlgmr.msra.gmra.mxu0 %vm33_vm0, %v28_v3  ;;  %964 = vmatprep.mubr.msk.f32.mxu1 %vm139_vm1, %v135_v6  ;;  %v1158_v17 = vld [vmem:[%s1323_s2 + $0x18] sm:$0xff]  ;;  %s1070_s2 = smov 96   ;;  %v568_v58 = vld [vmem:[%s1324_s3 + $0x10] sm:$0xff]  ;;  %vm533_vm4 = vcmask 1048320   ;;  %vm1073_vm5 = vmmov 0   ;;  %s1074_s30 = smov 32  }
   0x7   :  { %953 = vmatprep.mubr.msk.f32.mxu0 %vm33_vm0, %v29_v4  ;;  %v569_v56 = vld [vmem:[%s1324_s3 + $0x18] sm:$0xff]  ;;  %vm559_vm6 = vcmask 1040384   ;;  %vm561_vm7 = vcmask 1041408   ;;  %vm563_vm8 = vcmask 1042432   ;;  %vm659_vm9 = vcmask 64512  }
   0x8   :  { %vm733_vm10 = vcmask 257024  }
   0xa   :  { %954 = vmatmul.mubr.msk.f32.gmra.mxu0 %vm33_vm0, %v30_v5 }
   0xb   :  { %978 = vmatprep.mubr.msk.f32.mxu0 %vm139_vm1, %v135_v6 }
  0xc6   :  { %v952_v7 = vpop.f32.mrf.mxu0 }
  0xc8   :  { %v112_v8 = vpop.f32.mrf.mxu0 }
  0xca   :  { %v955_v9 = vpop.f32.mrf.mxu0 }
  0xcb   :  { %1036 = vtanh.f32 %v955_v9 }
  0xcc   :  { %v122_v10 = vpop.f32.mrf.mxu0 }
  0xcd   :  { %1038 = vtanh.f32 %v122_v10  ;;  %v651_v10 = vld [vmem:[%s1326_s5] sm:$0xff] }
  0xce   :  { %1040 = vtanh.f32 %v952_v7 }
  0xcf   :  { %1042 = vtanh.f32 %v112_v8  ;;  %v566_v8 = vld [vmem:[%s1324_s3] sm:$0xff] }
  0xd8   :  { %v1037_v11 = vpop.eup %1036 }
  0xd9   :  { %956 = vmatprep.subr.mxu1 %v1037_v11 }
  0xda   :  { %v1039_v12 = vpop.eup %1038  ;;  %957 = vmatpush3.msra.mxu1 %v1037_v11 }
  0xdb   :  { %958 = vmatprep.subr.mxu1 %v1039_v12  ;;  %v1041_v13 = vpop.eup %1040 }
  0xdc   :  { %959 = vmatpush3.msra.mxu1 %v1039_v12  ;;  %v1043_v14 = vpop.eup %1042 }
  0xdd   :  { %960 = vmatprep.subr.mxu1 %v1041_v13 }
  0xde   :  { %961 = vmatpush3.msra.mxu1 %v1041_v13 }
  0xdf   :  { %962 = vmatprep.subr.mxu1 %v1043_v14 }
  0xe0   :  { %963 = vmatpush3.msra.mxu1 %v1043_v14 }
  0xe1   :  { %965 = vmatmul.mubr.msk.f32.vlgmr.msra.gmra.mxu1 %vm139_vm1, %v1144_v15 }
  0xe2   :  { %967 = vmatprep.mubr.msk.f32.mxu1 %vm139_vm1, %v1149_v16 }
  0xe5   :  { %968 = vmatmul.mubr.msk.f32.gmra.mxu1 %vm139_vm1, %v1158_v17 }
  0xe6   :  { %992 = vmatprep.mubr.msk.f32.mxu1 %vm139_vm1, %v135_v6 }
 0x1a1   :  { %v1163_v18 = vpop.f32.mrf.mxu1 }
 0x1a3   :  { %v1165_v19 = vpop.f32.mrf.mxu1 }
 0x1a5   :  { %v1167_v20 = vpop.f32.mrf.mxu1 }
 0x1a6   :  { %970 = vmatprep.subr.mxu0 %v1167_v20 }
 0x1a7   :  { %v1170_v21 = vpop.f32.mrf.mxu1  ;;  %971 = vmatpush3.msra.mxu0 %v1167_v20 }
 0x1a8   :  { %972 = vmatprep.subr.mxu0 %v1170_v21 }
 0x1a9   :  { %973 = vmatpush3.msra.mxu0 %v1170_v21 }
 0x1aa   :  { %974 = vmatprep.subr.mxu0 %v1163_v18 }
 0x1ab   :  { %975 = vmatpush3.msra.mxu0 %v1163_v18 }
 0x1ac   :  { %976 = vmatprep.subr.mxu0 %v1165_v19 }
 0x1ad   :  { %977 = vmatpush3.msra.mxu0 %v1165_v19 }
 0x1ae   :  { %979 = vmatmul.mubr.msk.f32.vlgmr.msra.gmra.mxu0 %vm139_vm1, %v1144_v15 }
 0x1af   :  { %981 = vmatprep.mubr.msk.f32.mxu0 %vm139_vm1, %v1149_v16 }
 0x1b2   :  { %982 = vmatmul.mubr.msk.f32.gmra.mxu0 %vm139_vm1, %v1158_v17 }
 0x1b3   :  { %1006 = vmatprep.mubr.msk.f32.mxu0 %vm139_vm1, %v135_v6  ;;  %v567_v6 = vld [vmem:[%s1324_s3 + $0x8] sm:$0xff] }
 0x26e   :  { %v1186_v22 = vpop.f32.mrf.mxu0 }
 0x26f   :  { %v507_v26 = vsel %vm505_vm2, %v1186_v22, 0.0 }
 0x270   :  { %v1188_v23 = vpop.f32.mrf.mxu0 }
 0x271   :  { %v506_v24 = vsel %vm505_vm2, %v1188_v23, 0.0 }
 0x272   :  { %v1191_v25 = vpop.f32.mrf.mxu0  ;;  %v508_v27 = vadd.f32 %v507_v26, %v506_v24 }
 0x273   :  { %984 = vmatprep.subr.mxu1 %v1191_v25  ;;  %v511_v31 = vsel %vm505_vm2, %v1191_v25, 0.0 }
 0x274   :  { %v1195_v28 = vpop.f32.mrf.mxu0  ;;  %985 = vmatpush3.msra.mxu1 %v1191_v25 }
 0x275   :  { %v509_v29 = vsel %vm505_vm2, %v1195_v28, 0.0  ;;  %986 = vmatprep.subr.mxu1 %v1195_v28 }
 0x276   :  { %v510_v30 = vadd.f32 %v509_v29, %v508_v27  ;;  %987 = vmatpush3.msra.mxu1 %v1195_v28  ;;  %v497_v27 = vsel %vm139_vm1, %v1167_v20, 0.0 }
 0x277   :  { %988 = vmatprep.subr.mxu1 %v1186_v22 }
 0x278   :  { %989 = vmatpush3.msra.mxu1 %v1186_v22  ;;  %v512_v32 = vadd.f32 %v511_v31, %v510_v30 }
 0x279   :  { %990 = vmatprep.subr.mxu1 %v1188_v23 }
 0x27a   :  { %991 = vmatpush3.msra.mxu1 %v1188_v23  ;;  %v513_v33 = vrot.slane %v512_v32, 4 }
 0x27b   :  { %993 = vmatmul.mubr.msk.f32.vlgmr.msra.gmra.mxu1 %vm139_vm1, %v1144_v15  ;;  %1012 = vmatprep.subr.mxu1 %v1072_v57 }
 0x27c   :  { %995 = vmatprep.mubr.msk.f32.mxu1 %vm139_vm1, %v1149_v16  ;;  %v514_v34 = vadd.f32 %v513_v33, %v512_v32  ;;  %1013 = vmatpush3.msra.mxu1 %v569_v56 }
 0x27d   :  { %1014 = vmatprep.subr.mxu1 %v1072_v57 }
 0x27e   :  { %v515_v35 = vrot.slane %v514_v34, 2  ;;  %1015 = vmatpush3.msra.mxu1 %v568_v58 }
 0x27f   :  { %996 = vmatmul.mubr.msk.f32.gmra.mxu1 %vm139_vm1, %v1158_v17  ;;  %1016 = vmatprep.subr.mxu1 %v1072_v57 }
 0x280   :  { %v516_v36 = vadd.f32 %v515_v35, %v514_v34  ;;  %1017 = vmatpush3.msra.mxu1 %v567_v6  ;;  %1020 = vmatprep.mubr.msk.f32.mxu1 %vm1073_vm5, %v1072_v57 }
 0x281   :  { %1018 = vmatprep.subr.mxu1 %v1072_v57 }
 0x282   :  { %v517_v37 = vrot.slane %v516_v36, 1  ;;  %1019 = vmatpush3.msra.mxu1 %v566_v8 }
 0x284   :  { %v518_v38 = vadd.f32 %v517_v37, %v516_v36 }
 0x286   :  { %548 = vrot.lane.b32.xlu0 %v518_v38, %s1070_s2 }
 0x2f8   :  { %v549_v35 = vpop.permute.xlu0 %548 }
 0x33b   :  { %v1213_v39 = vpop.f32.mrf.mxu1 }
 0x33c   :  { %v521_v43 = vsel %vm519_vm3, %v1213_v39, 0.0 }
 0x33d   :  { %v1215_v40 = vpop.f32.mrf.mxu1 }
 0x33e   :  { %v520_v41 = vsel %vm519_vm3, %v1215_v40, 0.0 }
 0x33f   :  { %v1218_v42 = vpop.f32.mrf.mxu1  ;;  %v522_v44 = vadd.f32 %v521_v43, %v520_v41 }
 0x340   :  { %998 = vmatprep.subr.mxu0 %v1218_v42  ;;  %v525_v48 = vsel %vm519_vm3, %v1218_v42, 0.0 }
 0x341   :  { %v1222_v45 = vpop.f32.mrf.mxu1  ;;  %999 = vmatpush3.msra.mxu0 %v1218_v42 }
 0x342   :  { %v523_v46 = vsel %vm519_vm3, %v1222_v45, 0.0  ;;  %1000 = vmatprep.subr.mxu0 %v1222_v45 }
 0x343   :  { %v524_v47 = vadd.f32 %v523_v46, %v522_v44  ;;  %1001 = vmatpush3.msra.mxu0 %v1222_v45 }
 0x344   :  { %1002 = vmatprep.subr.mxu0 %v1213_v39 }
 0x345   :  { %v526_v49 = vadd.f32 %v525_v48, %v524_v47  ;;  %1003 = vmatpush3.msra.mxu0 %v1213_v39  ;;  %v897_v47 = vld [vmem:[%s1325_s4] ss:$0 sm:$0xff]  ;;  %s1075_s4 = smov [#allocation2]  }
 0x346   :  { %1004 = vmatprep.subr.mxu0 %v1215_v40 }
 0x347   :  { %1005 = vmatpush3.msra.mxu0 %v1215_v40  ;;  %v527_v50 = vrot.slane %v526_v49, 4 }
 0x348   :  { %1007 = vmatmul.mubr.msk.f32.vlgmr.msra.gmra.mxu0 %vm139_vm1, %v1144_v15  ;;  %1023 = vmatprep.subr.mxu0 %v1072_v57  ;;  %v492_v15 = vsel %vm139_vm1, %v1165_v19, 0.0 }
 0x349   :  { %1009 = vmatprep.mubr.msk.f32.mxu0 %vm139_vm1, %v1149_v16  ;;  %v528_v51 = vadd.f32 %v527_v50, %v526_v49  ;;  %1024 = vmatpush3.msra.mxu0 %v651_v10  ;;  %v493_v16 = vsel %vm139_vm1, %v1163_v18, 0.0 }
 0x34a   :  { %v494_v24 = vadd.f32 %v493_v16, %v492_v15 }
 0x34b   :  { %v529_v52 = vrot.slane %v528_v51, 2 }
 0x34c   :  { %1010 = vmatmul.mubr.msk.f32.gmra.mxu0 %vm139_vm1, %v1158_v17  ;;  %v495_v17 = vsel %vm139_vm1, %v1170_v21, 0.0 }
 0x34d   :  { %v530_v53 = vadd.f32 %v529_v52, %v528_v51  ;;  %1025 = vmatprep.mubr.msk.f32.mxu0 %vm1073_vm5, %v1072_v57  ;;  %v496_v26 = vadd.f32 %v495_v17, %v494_v24  ;;  %v899_v52 = vld [vmem:[%s1327_s6] ss:$0 sm:$0xff]  ;;  %s866_s6 = sshll.u32 %s1075_s4, 4  ;;  %s867_s6 = int_to_ptr.vmem [resolvable:$true] %s866_s6 }
 0x34e   :  { %s1048_s10 = scalar_lea.vmem %s867_s6, 512  ;;  %p1053_p1 = scmp.lt.s32.totalorder %s867_s6, %s867_s6 }
 0x34f   :  { %v531_v54 = vrot.slane %v530_v53, 1  ;;  %v498_v29 = vadd.f32 %v497_v27, %v496_v26  ;;  %p1049_p0 = scmp.ne.s32.totalorder %s867_s6, %s1048_s10  ;;  %p1054_p2 = scmp.lt.s32.totalorder %s1048_s10, %s1048_s10 }
 0x351   :  { %v532_v55 = vadd.f32 %v531_v54, %v530_v53  ;;  %v499_v30 = vrot.slane %v498_v29, 4  ;;  %p1055_p3 = por %p1054_p2, %p1053_p1 }
 0x353   :  { %552 = vrot.lane.b32.xlu0 %v532_v55, %s1071_s19  ;;  %v500_v31 = vadd.f32 %v499_v30, %v498_v29  ;;  %p1056_p4 = pnand %p1055_p3, %p1049_p0 }
 0x355   :  { %v501_v32 = vrot.slane %v500_v31, 2 }
 0x357   :  { %v502_v33 = vadd.f32 %v501_v32, %v500_v31 }
 0x359   :  { %v503_v34 = vrot.slane %v502_v33, 1 }
 0x35b   :  { %v504_v36 = vadd.f32 %v503_v34, %v502_v33 }
 0x35d   :  { %v560_v38 = vsel %vm559_vm6, %v504_v36, %v549_v35 }
 0x3c5   :  { %v553_v37 = vpop.permute.xlu0 %552 }
 0x3c6   :  { %v562_v41 = vsel %vm561_vm7, %v560_v38, %v553_v37 }
 0x408   :  { %v1246_v59 = vpop.f32.mrf.mxu0 }
 0x409   :  { %v535_v63 = vsel %vm533_vm4, %v1246_v59, 0.0 }
 0x40a   :  { %v1248_v60 = vpop.f32.mrf.mxu0 }
 0x40b   :  { %v534_v61 = vsel %vm533_vm4, %v1248_v60, 0.0 }
 0x40c   :  { %v1251_v62 = vpop.f32.mrf.mxu0  ;;  %v536_v0 = vadd.f32 %v535_v63, %v534_v61 }
 0x40d   :  { %v539_v4 = vsel %vm533_vm4, %v1251_v62, 0.0 }
 0x40e   :  { %v1254_v1 = vpop.f32.mrf.mxu0 }
 0x40f   :  { %v537_v2 = vsel %vm533_vm4, %v1254_v1, 0.0 }
 0x410   :  { %v538_v3 = vadd.f32 %v537_v2, %v536_v0 }
 0x412   :  { %v540_v5 = vadd.f32 %v539_v4, %v538_v3 }
 0x414   :  { %v541_v7 = vrot.slane %v540_v5, 4 }
 0x416   :  { %v542_v9 = vadd.f32 %v541_v7, %v540_v5 }
 0x418   :  { %v543_v11 = vrot.slane %v542_v9, 2 }
 0x41a   :  { %v544_v12 = vadd.f32 %v543_v11, %v542_v9 }
 0x41c   :  { %v545_v13 = vrot.slane %v544_v12, 1 }
 0x41e   :  { %v546_v14 = vadd.f32 %v545_v13, %v544_v12  ;;  %v753_v13 = vlaneseq }
 0x420   :  { %556 = vrot.lane.b32.xlu1 %v546_v14, %s1074_s30  ;;  %v754_v14 = vshrl.u32 %v753_v13, 7 }
 0x422   :  { %v795_v15 = vsub.s32 2, %v754_v14  ;;  %v763_v16 = vsub.s32 1, %v754_v14  ;;  %v755_v17 = vsub.s32 0, %v754_v14  ;;  %v827_v30 = vsub.s32 3, %v754_v14 }
 0x492   :  { %v557_v43 = vpop.permute.xlu1 %556 }
 0x493   :  { %v564_v44 = vsel %vm563_vm8, %v562_v41, %v557_v43 }
 0x494   :  { %v565_v46 = vmul.f32 0.03125, %v564_v44 }
 0x496   :  { %1021 = vmatmul.mubr.msk.f32.vlgmr.msra.gmra.mxu1 %vm139_vm1, %v565_v46 }
 0x556   :  { %v646_v48 = vpop.f32.mrf.mxu1 }
 0x557   :  { %v647_v49 = vadd.f32 %v897_v47, %v646_v48 }
 0x558   :  { %v1022_v50 = vpop.f32.mrf.mxu1 }
 0x559   :  { %v650_v51 = vmax.f32 %v647_v49, 0.0 }
 0x55b   :  { %1026 = vmatmul.mubr.msk.f32.vlgmr.msra.gmra.mxu0 %vm659_vm9, %v650_v51 }
 0x61b   :  { %v729_v53 = vpop.f32.mrf.mxu0 }
 0x61c   :  { %v730_v54 = vadd.f32 %v899_v52, %v729_v53 }
 0x61d   :  { %v1027_v55 = vpop.f32.mrf.mxu0 }
 0x61e   :  { %v734_v56 = vsel %vm733_vm10, %v730_v54, -inf }
 0x61f   :  { %v735_v57 = vrot.slane %v734_v56, 4 }
 0x621   :  { %v736_v58 = vmax.f32 %v734_v56, %v735_v57 }
 0x623   :  { %v737_v61 = vrot.slane %v736_v58, 2 }
 0x625   :  { %v738_v63 = vmax.f32 %v736_v58, %v737_v61 }
 0x627   :  { %v739_v0 = vrot.slane %v738_v63, 1 }
 0x629   :  { %v740_v2 = vmax.f32 %v738_v63, %v739_v0 }
 0x62b   :  { %v741_v3 = vsub.f32 %v730_v54, %v740_v2 }
 0x62d   :  { %v742_v4 = vmul.f32 1.442695, %v741_v3 }
 0x62f   :  { %1044 = vpow2.f32 %v742_v4 }
 0x63c   :  { %v1045_v5 = vpop.eup %1044 }
 0x63d   :  { %v744_v6 = vsel %vm733_vm10, %v1045_v5, 0.0 }
 0x63e   :  { %v745_v7 = vrot.slane %v744_v6, 4 }
 0x640   :  { %v746_v8 = vadd.f32 %v745_v7, %v744_v6 }
 0x642   :  { %v747_v9 = vrot.slane %v746_v8, 2 }
 0x644   :  { %v748_v10 = vadd.f32 %v747_v9, %v746_v8 }
 0x646   :  { %v749_v11 = vrot.slane %v748_v10, 1 }
 0x648   :  { %v750_v12 = vadd.f32 %v749_v11, %v748_v10 }
 0x64a   :  { %1046 = vrcp.f32 %v750_v12 }
 0x657   :  { %v1047_v24 = vpop.eup %1046 }
 0x658   :  { %v752_v26 = vmul.f32 %v1047_v24, %v1045_v5 }
 0x65a   :  { %v796_v27 = vrot.slane %v752_v26, %v795_v15  ;;  %v764_v29 = vrot.slane %v752_v26, %v763_v16  ;;  %v756_v31 = vrot.slane %v752_v26, %v755_v17  ;;  %v828_v32 = vrot.slane %v752_v26, %v827_v30 }
 0x65c   :  { %798 = vrot.lane.b32.xlu0 %v796_v27, %s1071_s19  ;;  %766 = vrot.lane.b32.xlu1 %v764_v29, %s1074_s30  ;;  %v758_v49 = vmul.f32 %v1163_v18, %v756_v31  ;;  %v760_v53 = vmul.f32 %v1167_v20, %v756_v31 }
 0x660   :  { %830 = vrot.lane.b32.xlu1 %v828_v32, %s1070_s2 }
 0x6ce   :  { %v767_v33 = vpop.permute.xlu1 %766  ;;  %v799_v38 = vpop.permute.xlu0 %798 }
 0x6cf   :  { %v770_v34 = vmul.f32 %v1186_v22, %v767_v33  ;;  %v769_v35 = vmul.f32 %v767_v33, %v1188_v23  ;;  %v772_v36 = vmul.f32 %v1191_v25, %v767_v33  ;;  %v771_v37 = vmul.f32 %v767_v33, %v1195_v28 }
 0x6d0   :  { %v802_v41 = vmul.f32 %v1213_v39, %v799_v38  ;;  %v801_v43 = vmul.f32 %v799_v38, %v1215_v40  ;;  %v804_v22 = vmul.f32 %v1218_v42, %v799_v38  ;;  %v803_v23 = vmul.f32 %v799_v38, %v1222_v45 }
 0x6d1   :  { %779 = vrot.lane.b32.xlu1 %v770_v34, %s1070_s2  ;;  %777 = vrot.lane.b32.xlu0 %v769_v35, %s1070_s2 }
 0x6d2   :  { %v831_v25 = vpop.permute.xlu1 %830 }
 0x6d3   :  { %v834_v28 = vmul.f32 %v1246_v59, %v831_v25  ;;  %v833_v44 = vmul.f32 %v831_v25, %v1248_v60  ;;  %v836_v39 = vmul.f32 %v1251_v62, %v831_v25  ;;  %v835_v40 = vmul.f32 %v831_v25, %v1254_v1 }
 0x6d4   :  { %v757_v60 = vmul.f32 %v756_v31, %v1165_v19  ;;  %v759_v1 = vmul.f32 %v756_v31, %v1170_v21 }
 0x6d5   :  { %783 = vrot.lane.b32.xlu1 %v772_v36, %s1070_s2  ;;  %781 = vrot.lane.b32.xlu0 %v771_v37, %s1070_s2 }
 0x6d9   :  { %811 = vrot.lane.b32.xlu1 %v802_v41, %s1071_s19  ;;  %809 = vrot.lane.b32.xlu0 %v801_v43, %s1071_s19 }
 0x6dd   :  { %815 = vrot.lane.b32.xlu1 %v804_v22, %s1071_s19  ;;  %813 = vrot.lane.b32.xlu0 %v803_v23, %s1071_s19 }
 0x6e1   :  { %843 = vrot.lane.b32.xlu1 %v834_v28, %s1074_s30  ;;  %841 = vrot.lane.b32.xlu0 %v833_v44, %s1074_s30 }
 0x6e5   :  { %847 = vrot.lane.b32.xlu1 %v836_v39, %s1074_s30  ;;  %845 = vrot.lane.b32.xlu0 %v835_v40, %s1074_s30 }
 0x743   :  { %v778_v42 = vpop.permute.xlu0 %777  ;;  %v780_v45 = vpop.permute.xlu1 %779 }
 0x744   :  { %v789_v52 = vadd.f32 %v778_v42, %v757_v60  ;;  %v790_v62 = vadd.f32 %v780_v45, %v758_v49 }
 0x747   :  { %v782_v46 = vpop.permute.xlu0 %781  ;;  %v784_v47 = vpop.permute.xlu1 %783 }
 0x748   :  { %v791_v58 = vadd.f32 %v782_v46, %v759_v1  ;;  %v792_v61 = vadd.f32 %v784_v47, %v760_v53 }
 0x74b   :  { %v810_v48 = vpop.permute.xlu0 %809  ;;  %v812_v59 = vpop.permute.xlu1 %811 }
 0x74c   :  { %v821_v54 = vadd.f32 %v810_v48, %v789_v52  ;;  %v822_v55 = vadd.f32 %v812_v59, %v790_v62 }
 0x74f   :  { %v814_v50 = vpop.permute.xlu0 %813  ;;  %v816_v51 = vpop.permute.xlu1 %815 }
 0x750   :  { %v823_v19 = vadd.f32 %v814_v50, %v791_v58  ;;  %v824_v18 = vadd.f32 %v816_v51, %v792_v61 }
 0x753   :  { %v842_v56 = vpop.permute.xlu0 %841  ;;  %v844_v57 = vpop.permute.xlu1 %843 }
 0x754   :  { %v853_v63 = vadd.f32 %v842_v56, %v821_v54  ;;  %v854_v0 = vadd.f32 %v844_v57, %v822_v55 }
 0x756   :  { %857 = vst.msk [vmem:[#allocation2] sm:$0xff] %vm139_vm1, %v853_v63  ;;  %858 = vst.msk [vmem:[#allocation2 + $0x8] sm:$0xff] %vm139_vm1, %v854_v0 }
 0x757   :  { %v846_v2 = vpop.permute.xlu0 %845  ;;  %v848_v21 = vpop.permute.xlu1 %847 }
 0x758   :  { %v855_v3 = vadd.f32 %v846_v2, %v823_v19  ;;  %v856_v20 = vadd.f32 %v848_v21, %v824_v18 }
 0x75a   :  { %859 = vst.msk [vmem:[#allocation2 + $0x10] sm:$0xff] %vm139_vm1, %v855_v3  ;;  %860 = vst.msk [vmem:[#allocation2 + $0x18] sm:$0xff] %vm139_vm1, %v856_v20 }
 0x75b   :  { %1059 = shalt.err (!%p1056_p4)
}
 0x75c   :  { %s1076_s1 = smov 128   ;;  %s1077_s11 = smov 8  }
 0x75d   :  { %872 = dma.vmem_to_hbm [thread:$0]  %s867_s6, 512, %s1328_s7, [#allocation3], %s1076_s1, %s1076_s1, %s1077_s11  }
 0x75e   :  { %1068 = dma.done.wait [#allocation3], 512  }
 0x75f   :  { %1069 = vsyncadd [#allocation3], 4294966784 }
 0x760   :  { %876 = vsyncpa [#allocation3], 1 }

</bundles_post_ra>
